<compile_context>
chip_gen: v5e
topology: v5e:2x2
jax: 0.10.0
libtpu: 0.0.40
codegen_flags: <defaults>
</compile_context>

<pallas_src>
import jax
import jax.numpy as jnp
from jax.experimental import pallas as pl
from jax.experimental.pallas import tpu as pltpu

BN_EPS = 1e-5            # nn.BatchNorm1d default eps
DROP_P = 0.2             # F.dropout(p=0.2), training=True by default
MAX_PAD = 4              # largest 'same' padding among branches: dilation*(k-1)//2 = 4

CIN = 47
CIN_PAD = 128            # lane-dense input channels
DILS = (1, 2, 4)
COUTS = (16, 32, 64)
COUT_TOT = sum(COUTS)    # 112
COUT_PAD = 128           # lane-dense combined output channels
SHIFT_DELTAS = (-4, -2, -1, 0, 1, 2, 4)          # 7 unique taps across the 3 dilations
SHIFTS = tuple(MAX_PAD + d for d in SHIFT_DELTAS)  # start offsets into length-padded input


def superconv_kernel(xpad_ref, u_ref, wc_ref, vecs_ref, w1_ref, w2_ref, out_ref):
    """Fully fused SuperConvBlock forward (single grid step, everything resident in VMEM)."""
    B, Lp, Cp = xpad_ref.shape           # (B, L + 2*MAX_PAD, 128)
    L = Lp - 2 * MAX_PAD
    n = B * L

    # --- all three dilated convs as ONE bf16 matmul: im2col over 7 unique shifts ---
    taps = [xpad_ref[:, s:s + L, :] for s in SHIFTS]                 # 7 x (B, L, 128)
    xs = jnp.concatenate(taps, axis=-1).reshape(n, len(SHIFTS) * Cp)  # (B*L, 896)
    h = jnp.dot(xs.astype(jnp.bfloat16), wc_ref[...],
                preferred_element_type=jnp.float32)                  # (B*L, 128) f32 acc

    # packed per-channel vectors (one (8,128) slab)
    bias = vecs_ref[0:1, :]
    gamma = vecs_ref[1:2, :]
    beta = vecs_ref[2:3, :]
    se_b1 = vecs_ref[3:4, :]
    se_b2 = vecs_ref[4:5, :]

    # --- bias + ReLU ---
    h = jnp.maximum(h + bias, 0.0)

    # --- BatchNorm1d (training mode, biased batch stats) in a single pass ---
    inv_n = 1.0 / n
    s1 = jnp.sum(h, axis=0, keepdims=True)
    s2 = jnp.sum(h * h, axis=0, keepdims=True)
    mean = s1 * inv_n
    var = jnp.maximum(s2 * inv_n - mean * mean, 0.0)
    hn = (h - mean) * (jax.lax.rsqrt(var + BN_EPS) * gamma) + beta
    h3 = hn.reshape(B, L, Cp)

    # --- SE blocks (block-diagonal, shared across branches): pool -> fc1 -> relu -> fc2 -> sigmoid ---
    pooled = jnp.mean(h3, axis=1)                                    # (B, 128)
    z = jnp.maximum(jnp.dot(pooled, w1_ref[...],
                            preferred_element_type=jnp.float32) + se_b1, 0.0)
    gate = jax.nn.sigmoid(jnp.dot(z, w2_ref[...],
                                  preferred_element_type=jnp.float32) + se_b2)
    hb = h3 * gate[:, None, :]                                       # (B, L, 128)

    # --- dropout p=0.2 (scale-at-train) applied per lane-aligned half while storing ---
    scale = 1.0 / (1.0 - DROP_P)
    keep = u_ref[...] >= DROP_P                                      # (B, L, 256)
    x_mid = xpad_ref[:, MAX_PAD:MAX_PAD + L, :]                      # original (padded) input
    out_ref[:, :, :Cp] = jnp.where(keep[:, :, :Cp], x_mid * scale, 0.0)
    out_ref[:, :, Cp:] = jnp.where(keep[:, :, Cp:], hb * scale, 0.0)


def init_branch_params(key):
    """Deterministic synthetic parameters (shapes mirror SuperConvBlock.__init__)."""
    out = []
    for i, (cin, cout) in enumerate([(CIN, c) for c in COUTS]):
        ks = jax.random.split(jax.random.fold_in(key, i), 8)
        conv_scale = 1.0 / jnp.sqrt(cin * 3.0)
        se_scale = 1.0 / jnp.sqrt(float(cout))
        out.append((
            jax.random.normal(ks[0], (3, cin, cout), jnp.float32) * conv_scale,  # conv W (K, Cin, Cout)
            jax.random.normal(ks[1], (cout,), jnp.float32) * conv_scale,         # conv bias
            1.0 + 0.1 * jax.random.normal(ks[2], (cout,), jnp.float32),          # BN gamma
            0.1 * jax.random.normal(ks[3], (cout,), jnp.float32),                # BN beta
            jax.random.normal(ks[4], (cout, cout), jnp.float32) * se_scale,      # SE fc1 W (in, out)
            jax.random.normal(ks[5], (cout,), jnp.float32) * se_scale,           # SE fc1 b
            jax.random.normal(ks[6], (cout, cout), jnp.float32) * se_scale,      # SE fc2 W (in, out)
            jax.random.normal(ks[7], (cout,), jnp.float32) * se_scale,           # SE fc2 b
        ))
    return out


def pack_params(branch_params):
    """Pack the 24 per-branch tensors into 4 lane-aligned slabs for the fused kernel."""
    wc = jnp.zeros((len(SHIFTS) * CIN_PAD, COUT_PAD), jnp.float32)   # fused conv weight
    vecs = jnp.zeros((8, COUT_PAD), jnp.float32)                     # bias/gamma/beta/se_b1/se_b2
    w1 = jnp.zeros((COUT_PAD, COUT_PAD), jnp.float32)                # block-diag SE fc1
    w2 = jnp.zeros((COUT_PAD, COUT_PAD), jnp.float32)                # block-diag SE fc2
    col = 0
    for (w, b, g, be, sw1, sb1, sw2, sb2), d, cout in zip(branch_params, DILS, COUTS):
        for k in range(3):
            si = SHIFT_DELTAS.index((k - 1) * d)
            wc = wc.at[si * CIN_PAD:si * CIN_PAD + CIN, col:col + cout].set(w[k])
        vecs = vecs.at[0, col:col + cout].set(b)
        vecs = vecs.at[1, col:col + cout].set(g)
        vecs = vecs.at[2, col:col + cout].set(be)
        vecs = vecs.at[3, col:col + cout].set(sb1)
        vecs = vecs.at[4, col:col + cout].set(sb2)
        w1 = w1.at[col:col + cout, col:col + cout].set(sw1)
        w2 = w2.at[col:col + cout, col:col + cout].set(sw2)
        col += cout
    return wc.astype(jnp.bfloat16), vecs, w1, w2


@jax.jit
def super_conv_block(x_ncl, key, wc, vecs, w1, w2):
    """PyTorch-style NCL in/out; channels-last lane-dense compute inside the kernel."""
    B, Cin, L = x_ncl.shape
    x_nlc = jnp.transpose(x_ncl, (0, 2, 1)).astype(jnp.float32)
    # pad length by MAX_PAD on both sides, channels 47 -> 128 (lane-dense)
    x_pad = jnp.pad(x_nlc, ((0, 0), (MAX_PAD, MAX_PAD), (0, CIN_PAD - Cin)))
    # dropout randoms generated directly in the padded (B, L, 256) output layout
    u = jax.random.uniform(key, (B, L, 2 * COUT_PAD), jnp.float32)

    vmem = pl.BlockSpec(memory_space=pltpu.MemorySpace.VMEM)
    out = pl.pallas_call(
        superconv_kernel,
        out_shape=jax.ShapeDtypeStruct((B, L, 2 * COUT_PAD), jnp.float32),
        in_specs=[vmem] * 6,
        out_specs=vmem,
        compiler_params=pltpu.CompilerParams(vmem_limit_bytes=32 << 20),
    )(x_pad, u, wc, vecs, w1, w2)

    # un-pad: [x(47) | o1(16) o2(32) o3(64)] -> (B, 159, L)
    out_nlc = jnp.concatenate(
        [out[:, :, :Cin], out[:, :, COUT_PAD:COUT_PAD + COUT_TOT]], axis=-1)
    return jnp.transpose(out_nlc, (0, 2, 1))


if __name__ == "__main__":
    key = jax.random.PRNGKey(0)
    kx, kp, kd = jax.random.split(key, 3)
    B, C, L = 2, 47, 16
    x = jax.random.normal(kx, (B, C, L), jnp.float32)

    wc, vecs, w1, w2 = pack_params(init_branch_params(kp))

    out = super_conv_block(x, kd, wc, vecs, w1, w2)
    out = jax.block_until_ready(out)
    assert out.shape == (B, CIN + COUT_TOT, L)
    assert bool(jnp.all(jnp.isfinite(out)))
    print("KERNEL_OK")
</pallas_src>

<mosaic_0001>
module attributes {stable_mosaic.version = 11 : i64} {
  func.func @superconv_kernel(%arg0: memref<2x24x128xf32, #tpu.memory_space<vmem>>, %arg1: memref<2x16x256xf32, #tpu.memory_space<vmem>>, %arg2: memref<896x128xbf16, #tpu.memory_space<vmem>>, %arg3: memref<8x128xf32, #tpu.memory_space<vmem>>, %arg4: memref<128x128xf32, #tpu.memory_space<vmem>>, %arg5: memref<128x128xf32, #tpu.memory_space<vmem>>, %arg6: memref<2x16x256xf32, #tpu.memory_space<vmem>>) attributes {dimension_semantics = [], scalar_prefetch = 0 : i64, scratch_operands = 0 : i64, tpu.core_type = #tpu.core_type<tc>} {
    %c0 = arith.constant 0 : index
    %c0_0 = arith.constant 0 : index
    %c0_1 = arith.constant 0 : index
    %0 = vector.load %arg0[%c0, %c0_0, %c0_1] : memref<2x24x128xf32, #tpu.memory_space<vmem>>, vector<2x16x128xf32>
    %c0_2 = arith.constant 0 : index
    %c2 = arith.constant 2 : index
    %c0_3 = arith.constant 0 : index
    %1 = vector.load %arg0[%c0_2, %c2, %c0_3] : memref<2x24x128xf32, #tpu.memory_space<vmem>>, vector<2x16x128xf32>
    %c0_4 = arith.constant 0 : index
    %c3 = arith.constant 3 : index
    %c0_5 = arith.constant 0 : index
    %2 = vector.load %arg0[%c0_4, %c3, %c0_5] : memref<2x24x128xf32, #tpu.memory_space<vmem>>, vector<2x16x128xf32>
    %c0_6 = arith.constant 0 : index
    %c4 = arith.constant 4 : index
    %c0_7 = arith.constant 0 : index
    %3 = vector.load %arg0[%c0_6, %c4, %c0_7] : memref<2x24x128xf32, #tpu.memory_space<vmem>>, vector<2x16x128xf32>
    %c0_8 = arith.constant 0 : index
    %c5 = arith.constant 5 : index
    %c0_9 = arith.constant 0 : index
    %4 = vector.load %arg0[%c0_8, %c5, %c0_9] : memref<2x24x128xf32, #tpu.memory_space<vmem>>, vector<2x16x128xf32>
    %c0_10 = arith.constant 0 : index
    %c6 = arith.constant 6 : index
    %c0_11 = arith.constant 0 : index
    %5 = vector.load %arg0[%c0_10, %c6, %c0_11] : memref<2x24x128xf32, #tpu.memory_space<vmem>>, vector<2x16x128xf32>
    %c0_12 = arith.constant 0 : index
    %c8 = arith.constant 8 : index
    %c0_13 = arith.constant 0 : index
    %6 = vector.load %arg0[%c0_12, %c8, %c0_13] : memref<2x24x128xf32, #tpu.memory_space<vmem>>, vector<2x16x128xf32>
    %7 = tpu.concatenate %0, %1, %2, %3, %4, %5, %6 in 2 : vector<2x16x128xf32>, vector<2x16x128xf32>, vector<2x16x128xf32>, vector<2x16x128xf32>, vector<2x16x128xf32>, vector<2x16x128xf32>, vector<2x16x128xf32> -> vector<2x16x896xf32>
    %8 = vector.shape_cast %7 : vector<2x16x896xf32> to vector<32x896xf32>
    %9 = arith.truncf %8 : vector<32x896xf32> to vector<32x896xbf16>
    %c0_14 = arith.constant 0 : index
    %c0_15 = arith.constant 0 : index
    %10 = vector.load %arg2[%c0_14, %c0_15] : memref<896x128xbf16, #tpu.memory_space<vmem>>, vector<896x128xbf16>
    %cst = arith.constant dense<0.000000e+00> : vector<32x128xf32>
    %11 = tpu.matmul %9, %10, %cst {dimension_numbers = #tpu.dot_dimension_numbers<[1], [0], [0], [1], [0, 0, 1, 1], [], []>} : vector<32x896xbf16>, vector<896x128xbf16>, vector<32x128xf32> -> vector<32x128xf32>
    %c0_16 = arith.constant 0 : index
    %c0_17 = arith.constant 0 : index
    %12 = vector.load %arg3[%c0_16, %c0_17] : memref<8x128xf32, #tpu.memory_space<vmem>>, vector<1x128xf32>
    %c1 = arith.constant 1 : index
    %c0_18 = arith.constant 0 : index
    %13 = vector.load %arg3[%c1, %c0_18] : memref<8x128xf32, #tpu.memory_space<vmem>>, vector<1x128xf32>
    %c2_19 = arith.constant 2 : index
    %c0_20 = arith.constant 0 : index
    %14 = vector.load %arg3[%c2_19, %c0_20] : memref<8x128xf32, #tpu.memory_space<vmem>>, vector<1x128xf32>
    %c3_21 = arith.constant 3 : index
    %c0_22 = arith.constant 0 : index
    %15 = vector.load %arg3[%c3_21, %c0_22] : memref<8x128xf32, #tpu.memory_space<vmem>>, vector<1x128xf32>
    %c4_23 = arith.constant 4 : index
    %c0_24 = arith.constant 0 : index
    %16 = vector.load %arg3[%c4_23, %c0_24] : memref<8x128xf32, #tpu.memory_space<vmem>>, vector<1x128xf32>
    %17 = vector.broadcast %12 : vector<1x128xf32> to vector<32x128xf32>
    %18 = arith.addf %11, %17 : vector<32x128xf32>
    %cst_25 = arith.constant 0.000000e+00 : f32
    %19 = vector.broadcast %cst_25 : f32 to vector<32x128xf32>
    %20 = arith.maximumf %18, %19 : vector<32x128xf32>
    %cst_26 = arith.constant dense<0.000000e+00> : vector<128xf32>
    %21 = vector.multi_reduction <add>, %20, %cst_26 [0] : vector<32x128xf32> to vector<128xf32>
    %22 = vector.shape_cast %21 : vector<128xf32> to vector<1x128xf32>
    %23 = arith.mulf %20, %20 : vector<32x128xf32>
    %cst_27 = arith.constant dense<0.000000e+00> : vector<128xf32>
    %24 = vector.multi_reduction <add>, %23, %cst_27 [0] : vector<32x128xf32> to vector<128xf32>
    %25 = vector.shape_cast %24 : vector<128xf32> to vector<1x128xf32>
    %cst_28 = arith.constant 3.125000e-02 : f32
    %26 = vector.broadcast %cst_28 : f32 to vector<1x128xf32>
    %27 = arith.mulf %22, %26 : vector<1x128xf32>
    %cst_29 = arith.constant 3.125000e-02 : f32
    %28 = vector.broadcast %cst_29 : f32 to vector<1x128xf32>
    %29 = arith.mulf %25, %28 : vector<1x128xf32>
    %30 = arith.mulf %27, %27 : vector<1x128xf32>
    %31 = arith.subf %29, %30 : vector<1x128xf32>
    %cst_30 = arith.constant 0.000000e+00 : f32
    %32 = vector.broadcast %cst_30 : f32 to vector<1x128xf32>
    %33 = arith.maximumf %31, %32 : vector<1x128xf32>
    %34 = vector.broadcast %27 : vector<1x128xf32> to vector<32x128xf32>
    %35 = arith.subf %20, %34 : vector<32x128xf32>
    %cst_31 = arith.constant 9.99999974E-6 : f32
    %36 = vector.broadcast %cst_31 : f32 to vector<1x128xf32>
    %37 = arith.addf %33, %36 : vector<1x128xf32>
    %38 = math.rsqrt %37 : vector<1x128xf32>
    %39 = arith.mulf %38, %13 : vector<1x128xf32>
    %40 = vector.broadcast %39 : vector<1x128xf32> to vector<32x128xf32>
    %41 = arith.mulf %35, %40 : vector<32x128xf32>
    %42 = vector.broadcast %14 : vector<1x128xf32> to vector<32x128xf32>
    %43 = arith.addf %41, %42 : vector<32x128xf32>
    %44 = vector.shape_cast %43 : vector<32x128xf32> to vector<2x16x128xf32>
    %cst_32 = arith.constant dense<0.000000e+00> : vector<2x128xf32>
    %45 = vector.multi_reduction <add>, %44, %cst_32 [1] : vector<2x16x128xf32> to vector<2x128xf32>
    %cst_33 = arith.constant 1.600000e+01 : f32
    %46 = vector.broadcast %cst_33 : f32 to vector<2x128xf32>
    %47 = arith.divf %45, %46 : vector<2x128xf32>
    %c0_34 = arith.constant 0 : index
    %c0_35 = arith.constant 0 : index
    %48 = vector.load %arg4[%c0_34, %c0_35] : memref<128x128xf32, #tpu.memory_space<vmem>>, vector<128x128xf32>
    %cst_36 = arith.constant dense<0.000000e+00> : vector<2x128xf32>
    %49 = tpu.matmul %47, %48, %cst_36 {dimension_numbers = #tpu.dot_dimension_numbers<[1], [0], [0], [1], [0, 0, 1, 1], [], []>} : vector<2x128xf32>, vector<128x128xf32>, vector<2x128xf32> -> vector<2x128xf32>
    %50 = vector.broadcast %15 : vector<1x128xf32> to vector<2x128xf32>
    %51 = arith.addf %49, %50 : vector<2x128xf32>
    %cst_37 = arith.constant 0.000000e+00 : f32
    %52 = vector.broadcast %cst_37 : f32 to vector<2x128xf32>
    %53 = arith.maximumf %51, %52 : vector<2x128xf32>
    %c0_38 = arith.constant 0 : index
    %c0_39 = arith.constant 0 : index
    %54 = vector.load %arg5[%c0_38, %c0_39] : memref<128x128xf32, #tpu.memory_space<vmem>>, vector<128x128xf32>
    %cst_40 = arith.constant dense<0.000000e+00> : vector<2x128xf32>
    %55 = tpu.matmul %53, %54, %cst_40 {dimension_numbers = #tpu.dot_dimension_numbers<[1], [0], [0], [1], [0, 0, 1, 1], [], []>} : vector<2x128xf32>, vector<128x128xf32>, vector<2x128xf32> -> vector<2x128xf32>
    %56 = vector.broadcast %16 : vector<1x128xf32> to vector<2x128xf32>
    %57 = arith.addf %55, %56 : vector<2x128xf32>
    %58 = arith.negf %57 : vector<2x128xf32>
    %59 = math.exp %58 : vector<2x128xf32>
    %cst_41 = arith.constant 1.000000e+00 : f32
    %60 = vector.broadcast %cst_41 : f32 to vector<2x128xf32>
    %61 = arith.addf %60, %59 : vector<2x128xf32>
    %62 = arith.divf %60, %61 : vector<2x128xf32>
    %63 = vector.shape_cast %62 : vector<2x128xf32> to vector<2x1x128xf32>
    %64 = vector.broadcast %63 : vector<2x1x128xf32> to vector<2x16x128xf32>
    %65 = arith.mulf %44, %64 : vector<2x16x128xf32>
    %c0_42 = arith.constant 0 : index
    %c0_43 = arith.constant 0 : index
    %c0_44 = arith.constant 0 : index
    %66 = vector.load %arg1[%c0_42, %c0_43, %c0_44] : memref<2x16x256xf32, #tpu.memory_space<vmem>>, vector<2x16x256xf32>
    %cst_45 = arith.constant 2.000000e-01 : f32
    %67 = vector.broadcast %cst_45 : f32 to vector<2x16x256xf32>
    %68 = arith.cmpf oge, %66, %67 : vector<2x16x256xf32>
    %c0_46 = arith.constant 0 : index
    %c4_47 = arith.constant 4 : index
    %c0_48 = arith.constant 0 : index
    %69 = vector.load %arg0[%c0_46, %c4_47, %c0_48] : memref<2x24x128xf32, #tpu.memory_space<vmem>>, vector<2x16x128xf32>
    %70 = vector.extract_strided_slice %68 {offsets = [0, 0, 0], sizes = [2, 16, 128], strides = [1, 1, 1]} : vector<2x16x256xi1> to vector<2x16x128xi1>
    %cst_49 = arith.constant 1.250000e+00 : f32
    %71 = vector.broadcast %cst_49 : f32 to vector<2x16x128xf32>
    %72 = arith.mulf %69, %71 : vector<2x16x128xf32>
    %cst_50 = arith.constant 0.000000e+00 : f32
    %73 = vector.broadcast %cst_50 : f32 to vector<2x16x128xf32>
    %74 = arith.select %70, %72, %73 : vector<2x16x128xi1>, vector<2x16x128xf32>
    %c0_51 = arith.constant 0 : index
    %c0_52 = arith.constant 0 : index
    %c0_53 = arith.constant 0 : index
    %75 = vector.load %arg6[%c0_51, %c0_52, %c0_53] : memref<2x16x256xf32, #tpu.memory_space<vmem>>, vector<2x16x128xf32>
    tpu.vector_store %arg6[%c0_51, %c0_52, %c0_53], %74 {strides = array<i32>} : memref<2x16x256xf32, #tpu.memory_space<vmem>>, vector<2x16x128xf32>,
    %76 = vector.extract_strided_slice %68 {offsets = [0, 0, 128], sizes = [2, 16, 128], strides = [1, 1, 1]} : vector<2x16x256xi1> to vector<2x16x128xi1>
    %cst_54 = arith.constant 1.250000e+00 : f32
    %77 = vector.broadcast %cst_54 : f32 to vector<2x16x128xf32>
    %78 = arith.mulf %65, %77 : vector<2x16x128xf32>
    %cst_55 = arith.constant 0.000000e+00 : f32
    %79 = vector.broadcast %cst_55 : f32 to vector<2x16x128xf32>
    %80 = arith.select %76, %78, %79 : vector<2x16x128xi1>, vector<2x16x128xf32>
    %c0_56 = arith.constant 0 : index
    %c0_57 = arith.constant 0 : index
    %c128 = arith.constant 128 : index
    %81 = vector.load %arg6[%c0_56, %c0_57, %c128] : memref<2x16x256xf32, #tpu.memory_space<vmem>>, vector<2x16x128xf32>
    tpu.vector_store %arg6[%c0_56, %c0_57, %c128], %80 {strides = array<i32>} : memref<2x16x256xf32, #tpu.memory_space<vmem>>, vector<2x16x128xf32>,
    return
  }
}

</mosaic_0001>

<bundles_post_ra>
// kernel: super_conv_block.1
= control target key start
LH: loop header
LB: loop body
LE: loop exit
PB: predicated region body
PF: predicated region fallthrough
CT: control target
= control target key end

     0   :  { %11 = vsyncpa [#allocation3], 0  ;;  %s1576_s0 = inlined_call_operand.vmem [shape: f32[2,24,128], index: 0, kind: input, shape index: {}]   ;;  %s1577_s1 = inlined_call_operand.vmem [shape: f32[2,16,256], index: 1, kind: input, shape index: {}]   ;;  %s1578_s2 = inlined_call_operand.hbm [shape: bf16[896,128], index: 2, kind: input, shape index: {}]   ;;  %s1579_s3 = inlined_call_operand.vmem [shape: f32[8,128], index: 3, kind: input, shape index: {}]   ;;  %s1580_s4 = inlined_call_operand.vmem [shape: f32[128,128], index: 4, kind: input, shape index: {}]   ;;  %s1581_s5 = inlined_call_operand.hbm [shape: f32[128,128], index: 5, kind: input, shape index: {}]   ;;  %s1582_s6 = inlined_call_operand.vmem [shape: f32[2,16,256], index: 6, kind: output, shape index: {}]  }
   0x1   :  { %s21_s23 = sshll.u32 %s1578_s2, 4  ;;  %s22_s23 = int_to_ptr.hbm [resolvable:$true] %s21_s23 }
   0x2   :  { %12 = vsyncpa [#allocation5], 0  ;;  %s1271_s24 = smov [#allocation2]   ;;  %s38_s28 = sshll.u32 %s1581_s5, 4  ;;  %s39_s28 = int_to_ptr.hbm [resolvable:$true] %s38_s28 }
   0x3   :  { %s23_s25 = sshll.u32 %s1271_s24, 4  ;;  %s1272_s29 = smov 64   ;;  %s24_s25 = int_to_ptr.vmem [resolvable:$true] %s23_s25 }
   0x4   :  { %s1273_s30 = smov 4   ;;  %s1274_s7 = smov [#allocation4]  }
   0x5   :  { %29 = dma.hbm_to_vmem [thread:$0]  %s22_s23, 7168, %s24_s25, [#allocation3], %s1272_s29, %s1272_s29, %s1273_s30  }
   0x6   :  { %s40_s8 = sshll.u32 %s1274_s7, 4  ;;  %s1275_s9 = smov 128   ;;  %s41_s8 = int_to_ptr.vmem [resolvable:$true] %s40_s8 }
   0x7   :  { %s1276_s10 = smov 8  }
   0x8   :  { %46 = dma.hbm_to_vmem [thread:$0]  %s39_s28, 2048, %s41_s8, [#allocation5], %s1275_s9, %s1275_s9, %s1276_s10  }
   0x9   :  { %1267 = dma.done.wait [#allocation3], 7168  }
   0xa   :  { %1268 = vsyncadd [#allocation3], 4294960128 }
   0xb   :  { %1269 = dma.done.wait [#allocation5], 2048  }
   0xc   :  { %1270 = vsyncadd [#allocation5], 4294965248  ;;  %v1151_v0 = vld [vmem:[#allocation2 + $0x38] sm:$0xff]  ;;  %v1150_v4 = vld [vmem:[#allocation2 + $0x30] sm:$0xff]  ;;  %vm783_vm8 = vcmask 1041409  }
   0xd   :  { %v1159_v1 = vld [vmem:[#allocation2 + $0x78] sm:$0xff]  ;;  %551 = vmatpush.bf16.msra.mxu0 %v1151_v0  ;;  %v1158_v5 = vld [vmem:[#allocation2 + $0x70] sm:$0xff]  ;;  %v1149_v8 = vld [vmem:[#allocation2 + $0x28] sm:$0xff] }
   0xe   :  { %v1167_v2 = vld [vmem:[#allocation2 + $0xb8] sm:$0xff]  ;;  %570 = vmatpush.bf16.msra.mxu1 %v1159_v1  ;;  %v1166_v6 = vld [vmem:[#allocation2 + $0xb0] sm:$0xff]  ;;  %v1157_v9 = vld [vmem:[#allocation2 + $0x68] sm:$0xff] }
   0xf   :  { %v1175_v3 = vld [vmem:[#allocation2 + $0xf8] sm:$0xff]  ;;  %589 = vmatpush.bf16.msra.mxu2 %v1167_v2  ;;  %v1174_v7 = vld [vmem:[#allocation2 + $0xf0] sm:$0xff]  ;;  %v1165_v10 = vld [vmem:[#allocation2 + $0xa8] sm:$0xff] }
  0x10   :  { %608 = vmatpush.bf16.msra.mxu3 %v1175_v3  ;;  %v1173_v11 = vld [vmem:[#allocation2 + $0xe8] sm:$0xff]  ;;  %v1148_v12 = vld [vmem:[#allocation2 + $0x20] sm:$0xff]  ;;  %v1147_v16 = vld [vmem:[#allocation2 + $0x18] sm:$0xff] }
  0x11   :  { %552 = vmatpush.bf16.msra.mxu0 %v1150_v4  ;;  %v1156_v13 = vld [vmem:[#allocation2 + $0x60] sm:$0xff]  ;;  %v1155_v17 = vld [vmem:[#allocation2 + $0x58] sm:$0xff]  ;;  %v1327_v20 = vld [vmem:[%s1576_s0 + $0xc] sm:$0xff] }
  0x12   :  { %571 = vmatpush.bf16.msra.mxu1 %v1158_v5  ;;  %v1164_v14 = vld [vmem:[#allocation2 + $0xa0] sm:$0xff]  ;;  %v1163_v18 = vld [vmem:[#allocation2 + $0x98] sm:$0xff]  ;;  %v875_v22 = vld [vmem:[%s1577_s1 + $0x10] sm:$0xff]  ;;  %v890_v25 = vmul.f32 1.25, %v1327_v20 }
  0x13   :  { %590 = vmatpush.bf16.msra.mxu2 %v1166_v6  ;;  %v1172_v15 = vld [vmem:[#allocation2 + $0xe0] sm:$0xff]  ;;  %v1171_v24 = vld [vmem:[#allocation2 + $0xd8] sm:$0xff]  ;;  %vm883_vm1 = vcmp.ge.f32.partialorder %v875_v22, 0.2  ;;  %v1146_v28 = vld [vmem:[#allocation2 + $0x10] sm:$0xff] }
  0x14   :  { %609 = vmatpush.bf16.msra.mxu3 %v1174_v7  ;;  %v1322_v19 = vld [vmem:[%s1576_s0 + $0x4] sm:$0xff]  ;;  %v894_v27 = vsel %vm883_vm1, %v890_v25, 0.0  ;;  %v1154_v29 = vld [vmem:[#allocation2 + $0x50] sm:$0xff]  ;;  %v1346_v35 = vld [vmem:[%s1576_s0 + $0x1c] sm:$0xff] }
  0x15   :  { %553 = vmatpush.bf16.msra.mxu0 %v1149_v8  ;;  %v873_v21 = vld [vmem:[%s1577_s1] sm:$0xff]  ;;  %v889_v23 = vmul.f32 1.25, %v1322_v19  ;;  %898 = vst [vmem:[%s1582_s6 + $0x10] sm:$0xff] %v894_v27  ;;  %v1162_v30 = vld [vmem:[#allocation2 + $0x90] sm:$0xff]  ;;  %v1145_v32 = vld [vmem:[#allocation2 + $0x8] sm:$0xff]  ;;  %v891_v39 = vmul.f32 1.25, %v1346_v35  ;;  %v86_v60 = vpack.c.bf16 %v1327_v20, %v1322_v19 }
  0x16   :  { %572 = vmatpush.bf16.msra.mxu1 %v1157_v9  ;;  %vm881_vm0 = vcmp.ge.f32.partialorder %v873_v21, 0.2  ;;  %v1170_v31 = vld [vmem:[#allocation2 + $0xd0] sm:$0xff]  ;;  %v1153_v33 = vld [vmem:[#allocation2 + $0x48] sm:$0xff]  ;;  %v877_v37 = vld [vmem:[%s1577_s1 + $0x20] sm:$0xff] }
  0x17   :  { %591 = vmatpush.bf16.msra.mxu2 %v1165_v10  ;;  %v893_v26 = vsel %vm881_vm0, %v889_v23, 0.0  ;;  %v1161_v34 = vld [vmem:[#allocation2 + $0x88] sm:$0xff]  ;;  %v879_v38 = vld [vmem:[%s1577_s1 + $0x30] sm:$0xff]  ;;  %vm885_vm2 = vcmp.ge.f32.partialorder %v877_v37, 0.2  ;;  %v1144_v42 = vld [vmem:[#allocation2] sm:$0xff] }
  0x18   :  { %610 = vmatpush.bf16.msra.mxu3 %v1173_v11  ;;  %897 = vst [vmem:[%s1582_s6] sm:$0xff] %v893_v26  ;;  %v1351_v36 = vld [vmem:[%s1576_s0 + $0x24] sm:$0xff]  ;;  %vm887_vm3 = vcmp.ge.f32.partialorder %v879_v38, 0.2  ;;  %v895_v45 = vsel %vm885_vm2, %v891_v39, 0.0  ;;  %v1199_v54 = vld [vmem:[#allocation2 + $0x1b8] sm:$0xff]  ;;  %v1198_v61 = vld [vmem:[#allocation2 + $0x1b0] sm:$0xff] }
  0x19   :  { %554 = vmatpush.bf16.msra.mxu0 %v1148_v12  ;;  %v1169_v40 = vld [vmem:[#allocation2 + $0xc8] sm:$0xff]  ;;  %v892_v41 = vmul.f32 1.25, %v1351_v36  ;;  %v1152_v43 = vld [vmem:[#allocation2 + $0x40] sm:$0xff]  ;;  %899 = vst [vmem:[%s1582_s6 + $0x20] sm:$0xff] %v895_v45  ;;  %v1183_v55 = vld [vmem:[#allocation2 + $0x138] sm:$0xff] }
  0x1a   :  { %573 = vmatpush.bf16.msra.mxu1 %v1156_v13  ;;  %v55_v44 = vld [vmem:[%s1576_s0] sm:$0xff]  ;;  %v1367_v48 = vld [vmem:[%s1576_s0 + $0x8] sm:$0xff]  ;;  %v1191_v59 = vld [vmem:[#allocation2 + $0x178] sm:$0xff] }
  0x1b   :  { %592 = vmatpush.bf16.msra.mxu2 %v1164_v14  ;;  %v1160_v46 = vld [vmem:[#allocation2 + $0x80] sm:$0xff]  ;;  %v896_v50 = vsel %vm887_vm3, %v892_v41, 0.0  ;;  %v60_v51 = vld [vmem:[%s1576_s0 + $0xa] sm:$0xff]  ;;  %v83_v56 = vpack.c.bf16 %v1367_v48, %v55_v44  ;;  %v57_v6 = vld [vmem:[%s1576_s0 + $0x18] sm:$0xff] }
  0x1c   :  { %611 = vmatpush.bf16.msra.mxu3 %v1172_v15  ;;  %v1168_v47 = vld [vmem:[#allocation2 + $0xc0] sm:$0xff]  ;;  %900 = vst [vmem:[%s1582_s6 + $0x30] sm:$0xff] %v896_v50  ;;  %v64_v53 = vld [vmem:[%s1576_s0 + $0xb] sm:$0xff]  ;;  %v1195_v12 = vld [vmem:[#allocation2 + $0x198] sm:$0xff] }
  0x1d   :  { %555 = vmatpush.bf16.msra.mxu0 %v1147_v16  ;;  %v59_v49 = vld [vmem:[%s1576_s0 + $0x2] sm:$0xff]  ;;  %v1182_v62 = vld [vmem:[#allocation2 + $0x130] sm:$0xff]  ;;  %v61_v8 = vld [vmem:[%s1576_s0 + $0x1a] sm:$0xff] }
  0x1e   :  { %574 = vmatpush.bf16.msra.mxu1 %v1155_v17  ;;  %v63_v52 = vld [vmem:[%s1576_s0 + $0x3] sm:$0xff]  ;;  %v84_v57 = vpack.c.bf16 %v60_v51, %v59_v49  ;;  %v1190_v63 = vld [vmem:[#allocation2 + $0x170] sm:$0xff]  ;;  %v65_v10 = vld [vmem:[%s1576_s0 + $0x1b] sm:$0xff] }
  0x1f   :  { %593 = vmatpush.bf16.msra.mxu2 %v1163_v18  ;;  %v85_v58 = vpack.c.bf16 %v64_v53, %v63_v52  ;;  %v1197_v0 = vld [vmem:[#allocation2 + $0x1a8] sm:$0xff]  ;;  %v1196_v3 = vld [vmem:[#allocation2 + $0x1a0] sm:$0xff]  ;;  %v1179_v13 = vld [vmem:[#allocation2 + $0x118] sm:$0xff]  ;;  %v93_v18 = vpack.c.bf16 %v1351_v36, %v1346_v35 }
  0x20   :  { %612 = vmatpush.bf16.msra.mxu3 %v1171_v24  ;;  %v1181_v1 = vld [vmem:[#allocation2 + $0x128] sm:$0xff]  ;;  %v1180_v4 = vld [vmem:[#allocation2 + $0x120] sm:$0xff]  ;;  %v1187_v17 = vld [vmem:[#allocation2 + $0x158] sm:$0xff] }
  0x21   :  { %556 = vmatpush.bf16.msra.mxu0 %v1146_v28  ;;  %v1189_v2 = vld [vmem:[#allocation2 + $0x168] sm:$0xff]  ;;  %v1188_v5 = vld [vmem:[#allocation2 + $0x160] sm:$0xff]  ;;  %v1194_v19 = vld [vmem:[#allocation2 + $0x190] sm:$0xff] }
  0x22   :  { %575 = vmatpush.bf16.msra.mxu1 %v1154_v29  ;;  %v58_v7 = vld [vmem:[%s1576_s0 + $0x20] sm:$0xff]  ;;  %v1178_v20 = vld [vmem:[#allocation2 + $0x110] sm:$0xff]  ;;  %v1193_v22 = vld [vmem:[#allocation2 + $0x188] sm:$0xff] }
  0x23   :  { %594 = vmatpush.bf16.msra.mxu2 %v1162_v30  ;;  %v62_v9 = vld [vmem:[%s1576_s0 + $0x22] sm:$0xff]  ;;  %v90_v14 = vpack.c.bf16 %v58_v7, %v57_v6  ;;  %v1186_v21 = vld [vmem:[#allocation2 + $0x150] sm:$0xff] }
  0x24   :  { %613 = vmatpush.bf16.msra.mxu3 %v1170_v31  ;;  %v66_v11 = vld [vmem:[%s1576_s0 + $0x23] sm:$0xff]  ;;  %v91_v15 = vpack.c.bf16 %v62_v9, %v61_v8  ;;  %v72_v29 = vld [vmem:[%s1576_s0 + $0xd] sm:$0xff] }
  0x25   :  { %557 = vmatpush.bf16.msra.mxu0 %v1145_v32  ;;  %v92_v16 = vpack.c.bf16 %v66_v11, %v65_v10  ;;  %v1177_v23 = vld [vmem:[#allocation2 + $0x108] sm:$0xff]  ;;  %v1192_v25 = vld [vmem:[#allocation2 + $0x180] sm:$0xff]  ;;  %v80_v32 = vld [vmem:[%s1576_s0 + $0x10] sm:$0xff] }
  0x26   :  { %576 = vmatpush.bf16.msra.mxu1 %v1153_v33  ;;  %v1185_v24 = vld [vmem:[#allocation2 + $0x148] sm:$0xff]  ;;  %v1176_v26 = vld [vmem:[#allocation2 + $0x100] sm:$0xff]  ;;  %v89_v35 = vpack.c.bf16 %v80_v32, %v1367_v48 }
  0x27   :  { %595 = vmatpush.bf16.msra.mxu2 %v1161_v34  ;;  %v1184_v27 = vld [vmem:[#allocation2 + $0x140] sm:$0xff]  ;;  %v76_v31 = vld [vmem:[%s1576_s0 + $0xe] sm:$0xff] }
  0x28   :  { %614 = vmatpush.bf16.msra.mxu3 %v1169_v40  ;;  %v71_v28 = vld [vmem:[%s1576_s0 + $0x5] sm:$0xff]  ;;  %v73_v36 = vld [vmem:[%s1576_s0 + $0x1d] sm:$0xff] }
  0x29   :  { %558 = vmatpush.bf16.msra.mxu0 %v1144_v42  ;;  %v75_v30 = vld [vmem:[%s1576_s0 + $0x6] sm:$0xff]  ;;  %v87_v33 = vpack.c.bf16 %v72_v29, %v71_v28  ;;  %v77_v38 = vld [vmem:[%s1576_s0 + $0x1e] sm:$0xff] }
  0x2a   :  { %577 = vmatpush.bf16.msra.mxu1 %v1152_v43  ;;  %v88_v34 = vpack.c.bf16 %v76_v31, %v75_v30  ;;  %v74_v37 = vld [vmem:[%s1576_s0 + $0x25] sm:$0xff] }
  0x2b   :  { %596 = vmatpush.bf16.msra.mxu2 %v1160_v46  ;;  %v78_v39 = vld [vmem:[%s1576_s0 + $0x26] sm:$0xff]  ;;  %v94_v41 = vpack.c.bf16 %v74_v37, %v73_v36 }
  0x2c   :  { %615 = vmatpush.bf16.msra.mxu3 %v1168_v47  ;;  %559 = vmatmul.bf16.vlgmr.msra.gmra.mxu0 %v83_v56  ;;  %v82_v40 = vld [vmem:[%s1576_s0 + $0x28] sm:$0xff]  ;;  %v95_v42 = vpack.c.bf16 %v78_v39, %v77_v38 }
  0x2d   :  { %627 = vmatpush.bf16.msrb.mxu0 %v1183_v55  ;;  %578 = vmatmul.bf16.vlgmr.msra.gmra.mxu1 %v84_v57  ;;  %v96_v43 = vpack.c.bf16 %v82_v40, %v58_v7  ;;  %v1207_v57 = vld [vmem:[%s1579_s3] ss:$0 sm:$0xff] }
  0x2e   :  { %597 = vmatmul.bf16.vlgmr.msra.gmra.mxu2 %v85_v58  ;;  %646 = vmatpush.bf16.msrb.mxu1 %v1191_v59 }
  0x2f   :  { %665 = vmatpush.bf16.msrb.mxu2 %v1199_v54  ;;  %616 = vmatmul.bf16.vlgmr.msra.gmra.mxu3 %v86_v60 }
  0x31   :  { %628 = vmatpush.bf16.msrb.mxu0 %v1182_v62 }
  0x32   :  { %647 = vmatpush.bf16.msrb.mxu1 %v1190_v63 }
  0x33   :  { %666 = vmatpush.bf16.msrb.mxu2 %v1198_v61 }
  0x35   :  { %629 = vmatpush.bf16.msrb.mxu0 %v1181_v1 }
  0x36   :  { %648 = vmatpush.bf16.msrb.mxu1 %v1189_v2 }
  0x37   :  { %667 = vmatpush.bf16.msrb.mxu2 %v1197_v0 }
  0x39   :  { %630 = vmatpush.bf16.msrb.mxu0 %v1180_v4 }
  0x3a   :  { %649 = vmatpush.bf16.msrb.mxu1 %v1188_v5 }
  0x3b   :  { %668 = vmatpush.bf16.msrb.mxu2 %v1196_v3 }
  0x3c   :  { %564 = vmatmul.bf16.gmra.mxu0 %v90_v14 }
  0x3d   :  { %631 = vmatpush.bf16.msrb.mxu0 %v1179_v13  ;;  %583 = vmatmul.bf16.gmra.mxu1 %v91_v15 }
  0x3e   :  { %602 = vmatmul.bf16.gmra.mxu2 %v92_v16  ;;  %650 = vmatpush.bf16.msrb.mxu1 %v1187_v17 }
  0x3f   :  { %669 = vmatpush.bf16.msrb.mxu2 %v1195_v12  ;;  %621 = vmatmul.bf16.gmra.mxu3 %v93_v18 }
  0x41   :  { %632 = vmatpush.bf16.msrb.mxu0 %v1178_v20 }
  0x42   :  { %651 = vmatpush.bf16.msrb.mxu1 %v1186_v21 }
  0x43   :  { %670 = vmatpush.bf16.msrb.mxu2 %v1194_v19 }
  0x45   :  { %633 = vmatpush.bf16.msrb.mxu0 %v1177_v23 }
  0x46   :  { %652 = vmatpush.bf16.msrb.mxu1 %v1185_v24 }
  0x47   :  { %671 = vmatpush.bf16.msrb.mxu2 %v1193_v22 }
  0x49   :  { %634 = vmatpush.bf16.msrb.mxu0 %v1176_v26 }
  0x4a   :  { %653 = vmatpush.bf16.msrb.mxu1 %v1184_v27 }
  0x4b   :  { %672 = vmatpush.bf16.msrb.mxu2 %v1192_v25 }
  0x4c   :  { %635 = vmatmul.bf16.vlgmr.msrb.gmra.mxu0 %v87_v33 }
  0x4d   :  { %654 = vmatmul.bf16.vlgmr.msrb.gmra.mxu1 %v88_v34 }
  0x4e   :  { %673 = vmatmul.bf16.vlgmr.msrb.gmra.mxu2 %v89_v35 }
  0x5c   :  { %640 = vmatmul.bf16.gmra.mxu0 %v94_v41 }
  0x5d   :  { %659 = vmatmul.bf16.gmra.mxu1 %v95_v42 }
  0x5e   :  { %678 = vmatmul.bf16.gmra.mxu2 %v96_v43 }
  0xa9   :  { %v560_v44 = vpop.f32.mrf.mxu0 }
  0xaa   :  { %v579_v45 = vpop.f32.mrf.mxu1  ;;  %v561_v61 = vadd.f32 %v1207_v57, %v560_v44 }
  0xac   :  { %v580_v1 = vadd.f32 %v579_v45, %v561_v61  ;;  %v776_v61 = vld [vmem:[%s1580_s4 + $0x60] sm:$0xff] }
  0xb1   :  { %v598_v46 = vpop.f32.mrf.mxu2  ;;  %v562_v47 = vpop.f32.mrf.mxu0 }
  0xb2   :  { %v581_v48 = vpop.f32.mrf.mxu1  ;;  %v617_v52 = vpop.f32.mrf.mxu3  ;;  %v563_v62 = vadd.f32 %v1207_v57, %v562_v47  ;;  %v599_v8 = vadd.f32 %v598_v46, %v580_v1 }
  0xb4   :  { %v582_v2 = vadd.f32 %v581_v48, %v563_v62  ;;  %v618_v13 = vadd.f32 %v617_v52, %v599_v8  ;;  %v779_v52 = vld [vmem:[%s1580_s4 + $0x78] sm:$0xff] }
  0xb5   :  { %786 = vmatpush.msrb.mxu3 %v779_v52 }
  0xb9   :  { %v600_v49 = vpop.f32.mrf.mxu2  ;;  %v565_v50 = vpop.f32.mrf.mxu0 }
  0xba   :  { %v584_v51 = vpop.f32.mrf.mxu1  ;;  %v619_v60 = vpop.f32.mrf.mxu3  ;;  %v566_v63 = vadd.f32 %v1207_v57, %v565_v50  ;;  %v601_v6 = vadd.f32 %v600_v49, %v582_v2 }
  0xbc   :  { %v585_v3 = vadd.f32 %v584_v51, %v566_v63  ;;  %v620_v10 = vadd.f32 %v619_v60, %v601_v6  ;;  %v773_v6 = vld [vmem:[%s1580_s4 + $0x48] sm:$0xff] }
  0xc1   :  { %v603_v53 = vpop.f32.mrf.mxu2  ;;  %v567_v54 = vpop.f32.mrf.mxu0 }
  0xc2   :  { %v586_v55 = vpop.f32.mrf.mxu1  ;;  %v622_v7 = vpop.f32.mrf.mxu3  ;;  %v604_v9 = vadd.f32 %v603_v53, %v585_v3  ;;  %v568_v11 = vadd.f32 %v1207_v57, %v567_v54  ;;  %v774_v3 = vld [vmem:[%s1580_s4 + $0x50] sm:$0xff] }
  0xc4   :  { %v623_v14 = vadd.f32 %v622_v7, %v604_v9  ;;  %v587_v17 = vadd.f32 %v586_v55, %v568_v11  ;;  %v778_v55 = vld [vmem:[%s1580_s4 + $0x70] sm:$0xff]  ;;  %v772_v9 = vld [vmem:[%s1580_s4 + $0x40] sm:$0xff]  ;;  %v771_v11 = vld [vmem:[%s1580_s4 + $0x38] sm:$0xff] }
  0xc5   :  { %787 = vmatpush.msrb.mxu3 %v778_v55 }
  0xc9   :  { %v605_v56 = vpop.f32.mrf.mxu2  ;;  %v636_v58 = vpop.f32.mrf.mxu0 }
  0xca   :  { %v655_v59 = vpop.f32.mrf.mxu1  ;;  %v637_v18 = vadd.f32 %v636_v58, %v618_v13  ;;  %v606_v21 = vadd.f32 %v605_v56, %v587_v17  ;;  %v624_v23 = vpop.f32.mrf.mxu3  ;;  %v777_v58 = vld [vmem:[%s1580_s4 + $0x68] sm:$0xff]  ;;  %v770_v13 = vld [vmem:[%s1580_s4 + $0x30] sm:$0xff]  ;;  %v767_v17 = vld [vmem:[%s1580_s4 + $0x18] sm:$0xff] }
  0xcb   :  { %788 = vmatpush.msrb.mxu3 %v777_v58 }
  0xcc   :  { %v656_v24 = vadd.f32 %v655_v59, %v637_v18  ;;  %v625_v28 = vadd.f32 %v624_v23, %v606_v21  ;;  %v766_v18 = vld [vmem:[%s1580_s4 + $0x10] sm:$0xff] }
  0xcd   :  { %789 = vmatpush.msrb.mxu3 %v776_v61 }
  0xd1   :  { %v674_v0 = vpop.f32.mrf.mxu2  ;;  %v638_v4 = vpop.f32.mrf.mxu0 }
  0xd2   :  { %v657_v5 = vpop.f32.mrf.mxu1  ;;  %v639_v15 = vadd.f32 %v638_v4, %v620_v10  ;;  %v675_v29 = vadd.f32 %v674_v0, %v656_v24  ;;  %v775_v0 = vld [vmem:[%s1580_s4 + $0x58] sm:$0xff] }
  0xd3   :  { %790 = vmatpush.msrb.mxu3 %v775_v0 }
  0xd4   :  { %v658_v22 = vadd.f32 %v657_v5, %v639_v15  ;;  %v1446_v34 = vmax.f32 %v675_v29, 0.0  ;;  %v820_v29 = vld [vmem:[#allocation4 + $0x68] sm:$0xff] }
  0xd5   :  { %791 = vmatpush.msrb.mxu3 %v774_v3 }
  0xd6   :  { %v697_v40 = vmul.f32 %v1446_v34, %v1446_v34 }
  0xd7   :  { %792 = vmatpush.msrb.mxu3 %v773_v6  ;;  %v810_v6 = vld [vmem:[#allocation4 + $0x18] sm:$0xff] }
  0xd9   :  { %v676_v12 = vpop.f32.mrf.mxu2  ;;  %v641_v16 = vpop.f32.mrf.mxu0  ;;  %793 = vmatpush.msrb.mxu3 %v772_v9  ;;  %v809_v9 = vld [vmem:[#allocation4 + $0x10] sm:$0xff] }
  0xda   :  { %v642_v19 = vadd.f32 %v641_v16, %v623_v14  ;;  %v660_v20 = vpop.f32.mrf.mxu1  ;;  %v677_v25 = vadd.f32 %v676_v12, %v658_v22  ;;  %v769_v14 = vld [vmem:[%s1580_s4 + $0x28] sm:$0xff]  ;;  %v768_v16 = vld [vmem:[%s1580_s4 + $0x20] sm:$0xff] }
  0xdb   :  { %794 = vmatpush.msrb.mxu3 %v771_v11  ;;  %v764_v22 = vld [vmem:[%s1580_s4] sm:$0xff] }
  0xdc   :  { %v661_v26 = vadd.f32 %v660_v20, %v642_v19  ;;  %v1444_v32 = vmax.f32 %v677_v25, 0.0  ;;  %v765_v19 = vld [vmem:[%s1580_s4 + $0x8] sm:$0xff]  ;;  %v822_v25 = vld [vmem:[#allocation4 + $0x78] sm:$0xff] }
  0xdd   :  { %795 = vmatpush.msrb.mxu3 %v770_v13  ;;  %824 = vmatpush.msra.mxu0 %v822_v25 }
  0xde   :  { %v698_v37 = vmul.f32 %v1444_v32, %v1444_v32  ;;  %v688_v41 = vadd.f32 %v1444_v32, %v1446_v34 }
  0xdf   :  { %796 = vmatpush.msrb.mxu3 %v769_v14 }
  0xe0   :  { %v701_v44 = vadd.f32 %v698_v37, %v697_v40  ;;  %v818_v37 = vld [vmem:[#allocation4 + $0x58] sm:$0xff] }
  0xe1   :  { %v679_v27 = vpop.f32.mrf.mxu2  ;;  %v643_v31 = vpop.f32.mrf.mxu0  ;;  %797 = vmatpush.msrb.mxu3 %v768_v16 }
  0xe2   :  { %v680_v30 = vadd.f32 %v679_v27, %v661_v26  ;;  %v644_v33 = vadd.f32 %v643_v31, %v625_v28  ;;  %v662_v36 = vpop.f32.mrf.mxu1  ;;  %v821_v26 = vld [vmem:[#allocation4 + $0x70] sm:$0xff]  ;;  %v1277_v27 = vmov 16.0  }
  0xe3   :  { %798 = vmatpush.msrb.mxu3 %v767_v17  ;;  %825 = vmatpush.msra.mxu0 %v821_v26 }
  0xe4   :  { %v1448_v35 = vmax.f32 %v680_v30, 0.0  ;;  %v663_v38 = vadd.f32 %v662_v36, %v644_v33  ;;  %v210_v30 = vld [vmem:[%s1579_s3 + $0x1] sm:$0x1] }
  0xe5   :  { %799 = vmatpush.msrb.mxu3 %v766_v18  ;;  %v819_v33 = vld [vmem:[#allocation4 + $0x60] sm:$0xff]  ;;  %826 = vmatpush.msra.mxu0 %v820_v29  ;;  %v808_v18 = vld [vmem:[#allocation4 + $0x8] sm:$0xff] }
  0xe6   :  { %v699_v42 = vmul.f32 %v1448_v35, %v1448_v35  ;;  %v689_v45 = vadd.f32 %v688_v41, %v1448_v35  ;;  %v817_v41 = vld [vmem:[#allocation4 + $0x50] sm:$0xff] }
  0xe7   :  { %800 = vmatpush.msrb.mxu3 %v765_v19  ;;  %827 = vmatpush.msra.mxu0 %v819_v33  ;;  %v807_v19 = vld [vmem:[#allocation4] sm:$0xff] }
  0xe8   :  { %v702_v47 = vadd.f32 %v701_v44, %v699_v42  ;;  %v1208_v44 = vld [vmem:[%s1579_s3 + $0x2] ss:$0 sm:$0xff] }
  0xe9   :  { %v681_v39 = vpop.f32.mrf.mxu2  ;;  %801 = vmatpush.msrb.mxu3 %v764_v22  ;;  %828 = vmatpush.msra.mxu0 %v818_v37 }
  0xea   :  { %v682_v43 = vadd.f32 %v681_v39, %v663_v38 }
  0xeb   :  { %829 = vmatpush.msra.mxu0 %v817_v41 }
  0xec   :  { %v1459_v46 = vmax.f32 %v682_v43, 0.0 }
  0xee   :  { %v690_v48 = vadd.f32 %v689_v45, %v1459_v46  ;;  %v700_v49 = vmul.f32 %v1459_v46, %v1459_v46 }
  0xf0   :  { %v691_v50 = vrot.slane %v690_v48, 4  ;;  %v703_v51 = vadd.f32 %v702_v47, %v700_v49  ;;  %v816_v49 = vld [vmem:[#allocation4 + $0x48] sm:$0xff] }
  0xf1   :  { %830 = vmatpush.msra.mxu0 %v816_v49 }
  0xf2   :  { %v692_v53 = vadd.f32 %v691_v50, %v690_v48  ;;  %v704_v54 = vrot.slane %v703_v51, 4 }
  0xf4   :  { %v693_v56 = vrot.slane %v692_v53, 2  ;;  %v705_v57 = vadd.f32 %v704_v54, %v703_v51 }
  0xf6   :  { %v694_v59 = vadd.f32 %v693_v56, %v692_v53  ;;  %v706_v60 = vrot.slane %v705_v57, 2 }
  0xf8   :  { %v695_v62 = vrot.slane %v694_v59, 1  ;;  %v707_v63 = vadd.f32 %v706_v60, %v705_v57 }
  0xfa   :  { %v696_v1 = vadd.f32 %v695_v62, %v694_v59  ;;  %v708_v2 = vrot.slane %v707_v63, 1  ;;  %v813_v59 = vld [vmem:[#allocation4 + $0x30] sm:$0xff] }
  0xfc   :  { %v709_v4 = vadd.f32 %v708_v2, %v707_v63  ;;  %v1482_v5 = vmul.f32 0.03125, %v696_v1  ;;  %v812_v63 = vld [vmem:[#allocation4 + $0x28] sm:$0xff]  ;;  %v811_v2 = vld [vmem:[#allocation4 + $0x20] sm:$0xff] }
  0xfe   :  { %v711_v7 = vmul.f32 0.03125, %v709_v4  ;;  %v712_v8 = vmul.f32 %v1482_v5, %v1482_v5  ;;  %v717_v40 = vsub.f32 %v1448_v35, %v1482_v5  ;;  %v718_v42 = vsub.f32 %v1459_v46, %v1482_v5  ;;  %v815_v46 = vld [vmem:[#allocation4 + $0x40] sm:$0xff] }
  0xff   :  { %v715_v45 = vsub.f32 %v1446_v34, %v1482_v5  ;;  %v716_v47 = vsub.f32 %v1444_v32, %v1482_v5  ;;  %v814_v32 = vld [vmem:[#allocation4 + $0x38] sm:$0xff]  ;;  %831 = vmatpush.msra.mxu0 %v815_v46 }
 0x100   :  { %v713_v10 = vsub.f32 %v711_v7, %v712_v8 }
 0x101   :  { %832 = vmatpush.msra.mxu0 %v814_v32 }
 0x102   :  { %v714_v12 = vmax.f32 %v713_v10, 0.0 }
 0x103   :  { %833 = vmatpush.msra.mxu0 %v813_v59 }
 0x104   :  { %v719_v15 = vadd.f32 1e-05, %v714_v12 }
 0x105   :  { %834 = vmatpush.msra.mxu0 %v812_v63 }
 0x106   :  { %1211 = vrsqrt.f32 %v719_v15  ;;  %vm726_vm5 = vweird.f32 %v719_v15 }
 0x107   :  { %1213 = vrcp.f32 %v1277_v27  ;;  %835 = vmatpush.msra.mxu0 %v811_v2 }
 0x109   :  { %836 = vmatpush.msra.mxu0 %v810_v6 }
 0x10b   :  { %837 = vmatpush.msra.mxu0 %v809_v9 }
 0x10c   :  { %v1212_v20 = vpop.eup %1211 }
 0x10d   :  { %v721_v21 = vmul.f32 %v1212_v20, %v719_v15  ;;  %vm727_vm4 = vweird.f32 %v1212_v20  ;;  %v1214_v38 = vpop.eup %1213  ;;  %838 = vmatpush.msra.mxu0 %v808_v18 }
 0x10e   :  { %vm728_vm6 = vmor %vm726_vm5, %vm727_vm4  ;;  %v756_v48 = vmul.f32 16.0, %v1214_v38  ;;  %vm760_vm7 = vweird.f32 %v1214_v38 }
 0x10f   :  { %v722_v23 = vmul.f32 %v1212_v20, %v721_v21  ;;  %839 = vmatpush.msra.mxu0 %v807_v19 }
 0x110   :  { %v757_v34 = vsub.f32 1.0, %v756_v48 }
 0x111   :  { %v723_v24 = vmul.f32 0.5, %v722_v23 }
 0x112   :  { %v758_v62 = vmul.f32 %v1214_v38, %v757_v34 }
 0x113   :  { %v724_v28 = vsub.f32 1.5, %v723_v24  ;;  %v1210_v24 = vld [vmem:[%s1579_s3 + $0x4] ss:$0 sm:$0xff] }
 0x114   :  { %v759_v5 = vadd.f32 %v1214_v38, %v758_v62 }
 0x115   :  { %v725_v31 = vmul.f32 %v1212_v20, %v724_v28 }
 0x116   :  { %v761_v12 = vsel %vm760_vm7, %v1214_v38, %v759_v5 }
 0x117   :  { %v729_v36 = vsel %vm728_vm6, %v1212_v20, %v725_v31  ;;  %v1209_v20 = vld [vmem:[%s1579_s3 + $0x3] ss:$0 sm:$0xff] }
 0x118   :  { %v730_v39 = vmul.f32 %v729_v36, %v210_v30 }
 0x11a   :  { %v731_v43 = vperm.slane %v730_v39, 0 }
 0x11c   :  { %v734_v50 = vmul.f32 %v731_v43, %v717_v40  ;;  %v735_v35 = vmul.f32 %v731_v43, %v718_v42  ;;  %v732_v51 = vmul.f32 %v731_v43, %v715_v45  ;;  %v733_v52 = vmul.f32 %v731_v43, %v716_v47  ;;  %v874_v45 = vld [vmem:[%s1577_s1 + $0x8] sm:$0xff]  ;;  %v876_v47 = vld [vmem:[%s1577_s1 + $0x18] sm:$0xff] }
 0x11d   :  { %vm882_vm13 = vcmp.ge.f32.partialorder %v874_v45, 0.2  ;;  %vm884_vm14 = vcmp.ge.f32.partialorder %v876_v47, 0.2 }
 0x11e   :  { %v1530_v53 = vadd.f32 %v1208_v44, %v734_v50  ;;  %v1532_v54 = vadd.f32 %v1208_v44, %v735_v35  ;;  %v1534_v55 = vadd.f32 %v1208_v44, %v732_v51  ;;  %v1536_v56 = vadd.f32 %v1208_v44, %v733_v52  ;;  %v878_v35 = vld [vmem:[%s1577_s1 + $0x28] sm:$0xff]  ;;  %v880_v51 = vld [vmem:[%s1577_s1 + $0x38] sm:$0xff] }
 0x11f   :  { %vm886_vm15 = vcmp.ge.f32.partialorder %v878_v35, 0.2  ;;  %vm888_vm0 = vcmp.ge.f32.partialorder %v880_v51, 0.2 }
 0x120   :  { %v748_v57 = vadd.f32 %v1532_v54, %v1530_v53  ;;  %v741_v58 = vadd.f32 %v1536_v56, %v1534_v55 }
 0x122   :  { %v749_v60 = vrot.slane %v748_v57, 4  ;;  %v742_v61 = vrot.slane %v741_v58, 4 }
 0x124   :  { %v743_v0 = vadd.f32 %v742_v61, %v741_v58  ;;  %v750_v1 = vadd.f32 %v749_v60, %v748_v57 }
 0x126   :  { %v744_v3 = vrot.slane %v743_v0, 2  ;;  %v751_v4 = vrot.slane %v750_v1, 2 }
 0x128   :  { %v745_v7 = vadd.f32 %v744_v3, %v743_v0  ;;  %v752_v8 = vadd.f32 %v751_v4, %v750_v1 }
 0x12a   :  { %v746_v10 = vrot.slane %v745_v7, 1  ;;  %v753_v11 = vrot.slane %v752_v8, 1 }
 0x12c   :  { %v747_v13 = vadd.f32 %v746_v10, %v745_v7  ;;  %v754_v14 = vadd.f32 %v753_v11, %v752_v8 }
 0x12e   :  { %v762_v15 = vmul.f32 %v761_v12, %v747_v13  ;;  %v763_v16 = vmul.f32 %v761_v12, %v754_v14 }
 0x130   :  { %v784_v17 = vsel %vm783_vm8, %v763_v16, %v762_v15 }
 0x131   :  { %802 = vmatmul.f32.vlgmr.msrb.gmra.mxu3 %v784_v17 }
 0x1b4   :  { %v803_v21 = vpop.f32.mrf.mxu3 }
 0x1b5   :  { %v804_v22 = vadd.f32 %v1209_v20, %v803_v21 }
 0x1b7   :  { %v806_v23 = vmax.f32 %v804_v22, 0.0 }
 0x1b9   :  { %840 = vmatmul.f32.vlgmr.msra.gmra.mxu0 %v806_v23 }
 0x236   :  { %v841_v25 = vpop.f32.mrf.mxu0 }
 0x237   :  { %v842_v26 = vadd.f32 %v1210_v24, %v841_v25 }
 0x239   :  { %v1143_v27 = vmul.f32 -1.442695, %v842_v26 }
 0x23b   :  { %1215 = vpow2.f32 %v1143_v27 }
 0x241   :  { %v1216_v28 = vpop.eup %1215 }
 0x242   :  { %v847_v29 = vadd.f32 1.0, %v1216_v28 }
 0x244   :  { %1217 = vrcp.f32 %v847_v29  ;;  %v859_v36 = vand.u32 2147483648, %v847_v29  ;;  %v857_v38 = vand.u32 2147483647, %v847_v29  ;;  %vm853_vm10 = vweird.f32 %v847_v29 }
 0x246   :  { %v860_v40 = vor.u32 1.1754944e-38, %v859_v36  ;;  %vm858_vm12 = vcmp.eq.f32.partialorder %v857_v38, 8.507059e+37 }
 0x24a   :  { %v1218_v30 = vpop.eup %1217 }
 0x24b   :  { %v849_v31 = vmul.f32 %v1218_v30, %v847_v29  ;;  %vm854_vm9 = vweird.f32 %v1218_v30 }
 0x24c   :  { %vm855_vm11 = vmor %vm853_vm10, %vm854_vm9 }
 0x24d   :  { %v850_v33 = vsub.f32 1.0, %v849_v31 }
 0x24f   :  { %v851_v37 = vmul.f32 %v1218_v30, %v850_v33 }
 0x251   :  { %v852_v39 = vadd.f32 %v1218_v30, %v851_v37 }
 0x253   :  { %v856_v41 = vsel %vm855_vm11, %v1218_v30, %v852_v39 }
 0x254   :  { %v861_v42 = vsel %vm858_vm12, %v860_v40, %v856_v41 }
 0x255   :  { %v864_v43 = vrot.slane %v861_v42, 1  ;;  %v865_v44 = vperm.slane %v861_v42, 0 }
 0x257   :  { %v866_v48 = vperm.slane %v864_v43, 0  ;;  %v869_v49 = vmul.f32 %v865_v44, %v1534_v55  ;;  %v870_v50 = vmul.f32 %v865_v44, %v1536_v56 }
 0x259   :  { %v871_v52 = vmul.f32 %v866_v48, %v1530_v53  ;;  %v872_v46 = vmul.f32 %v866_v48, %v1532_v54  ;;  %v901_v34 = vmul.f32 1.25, %v869_v49  ;;  %v902_v32 = vmul.f32 1.25, %v870_v50 }
 0x25b   :  { %v903_v55 = vmul.f32 1.25, %v871_v52  ;;  %v904_v56 = vmul.f32 1.25, %v872_v46  ;;  %v905_v57 = vsel %vm882_vm13, %v901_v34, 0.0  ;;  %v906_v58 = vsel %vm884_vm14, %v902_v32, 0.0 }
 0x25c   :  { %909 = vst [vmem:[%s1582_s6 + $0x8] sm:$0xff] %v905_v57 }
 0x25d   :  { %v907_v59 = vsel %vm886_vm15, %v903_v55, 0.0  ;;  %v908_v60 = vsel %vm888_vm0, %v904_v56, 0.0  ;;  %910 = vst [vmem:[%s1582_s6 + $0x18] sm:$0xff] %v906_v58 }
 0x25e   :  { %911 = vst [vmem:[%s1582_s6 + $0x28] sm:$0xff] %v907_v59 }
 0x25f   :  { %912 = vst [vmem:[%s1582_s6 + $0x38] sm:$0xff] %v908_v60 }
 0x260   :  { %917 = vsyncpa [#allocation3], 1 }
 0x261   :  { %918 = vsyncpa [#allocation5], 1 }

</bundles_post_ra>
